<compile_context>
chip_gen: v7x
topology: tpu7x:2x2x1
jax: 0.10.0
libtpu: 0.0.40
codegen_flags: <defaults>
</compile_context>

<pallas_src>
import math

import numpy as np
import jax
import jax.numpy as jnp
from jax import lax
from jax.experimental import pallas as pl
from jax.experimental.pallas import tpu as pltpu

OUT_HW = 224                      # hard-coded in Clip.forward
POOL = 7                          # synthetic image tower pools 224x224 -> 7x7
IMAGENET_MEAN = np.array([0.485, 0.456, 0.406], dtype=np.float64)
IMAGENET_STD = np.array([0.229, 0.224, 0.225], dtype=np.float64)


def _bicubic_resize_matrix(in_size: int, out_size: int, a: float = -0.75) -> np.ndarray:
    """Dense (out_size, in_size) float64 matrix replicating PyTorch bicubic
    resize (align_corners=False, Keys a=-0.75, border indices clamped)."""
    M = np.zeros((out_size, in_size), dtype=np.float64)
    scale = in_size / out_size
    for j in range(out_size):
        src = (j + 0.5) * scale - 0.5
        f = math.floor(src)
        for k in range(-1, 3):
            idx = min(max(f + k, 0), in_size - 1)
            d = abs(src - (f + k))
            if d <= 1.0:
                w = (a + 2.0) * d ** 3 - (a + 3.0) * d ** 2 + 1.0
            elif d < 2.0:
                w = a * d ** 3 - 5.0 * a * d ** 2 + 8.0 * a * d - 4.0 * a
            else:
                w = 0.0
            M[j, idx] += w
    return M


def _avg_pool_matrix(in_size: int, out_size: int) -> np.ndarray:
    """(out_size, in_size) float64 mean-pooling matrix (exact block mean)."""
    assert in_size % out_size == 0
    k = in_size // out_size
    M = np.zeros((out_size, in_size), dtype=np.float64)
    for i in range(out_size):
        M[i, i * k:(i + 1) * k] = 1.0 / k
    return M


# ----------------------------------------------------------------------------
# Single fused kernel:
#   image path : ie = x_flat @ G + bias_g        (all preprocessing pre-folded)
#   text path  : te = y @ w_txt
#   head       : out = (-logit_scale) * l2norm(ie) @ l2norm(te)^T
# Single grid step; every operand lives fully in VMEM (scale scalar in SMEM).
# ----------------------------------------------------------------------------
def _clip_fused_kernel(xf_ref, g_ref, bias_ref, y_ref, wt_ref, nscale_ref, o_ref):
    # xf_ref: (B, C*H*W) f32       g_ref: (C*H*W, E) f32   bias_ref: (1, E) f32
    # y_ref:  (Bt, T)    f32       wt_ref: (T, E) f32
    # nscale_ref: (1,) f32 in SMEM (= -logit_scale, negation folded)
    # o_ref: (B, Bt) f32
    ie = jnp.dot(xf_ref[...], g_ref[...],
                 preferred_element_type=jnp.float32) + bias_ref[...]        # (B, E)
    te = jnp.dot(y_ref[...], wt_ref[...],
                 preferred_element_type=jnp.float32)                        # (Bt, E)
    ie = ie * lax.rsqrt(jnp.sum(ie * ie, axis=-1, keepdims=True) + 1e-12)
    te = te * lax.rsqrt(jnp.sum(te * te, axis=-1, keepdims=True) + 1e-12)
    sim = lax.dot_general(ie, te, (((1,), (1,)), ((), ())),
                          preferred_element_type=jnp.float32)               # (B, Bt)
    o_ref[...] = nscale_ref[0] * sim


def clip_forward_neg_logits(x_flat, g_mat, bias_g, y, w_txt, neg_scale):
    B = x_flat.shape[0]
    Bt = y.shape[0]
    return pl.pallas_call(
        _clip_fused_kernel,
        out_shape=jax.ShapeDtypeStruct((B, Bt), jnp.float32),
        in_specs=[
            pl.BlockSpec(memory_space=pltpu.MemorySpace.VMEM),   # x_flat
            pl.BlockSpec(memory_space=pltpu.MemorySpace.VMEM),   # G
            pl.BlockSpec(memory_space=pltpu.MemorySpace.VMEM),   # bias
            pl.BlockSpec(memory_space=pltpu.MemorySpace.VMEM),   # y
            pl.BlockSpec(memory_space=pltpu.MemorySpace.VMEM),   # w_txt
            pl.BlockSpec(memory_space=pltpu.MemorySpace.SMEM),   # -logit_scale
        ],
        out_specs=pl.BlockSpec(memory_space=pltpu.MemorySpace.VMEM),
    )(x_flat, g_mat, bias_g, y, w_txt, neg_scale)


if __name__ == "__main__":
    B, C, H, W = 2, 3, 16, 16         # CLIP expects 3-channel images
    TXT_DIM, EMB_DIM = 32, 32

    key = jax.random.PRNGKey(0)
    kx, ky, kwi, kwt = jax.random.split(key, 4)

    x = jax.random.uniform(kx, (B, C, H, W), jnp.float32, minval=-1.0, maxval=1.0)
    y = jax.random.normal(ky, (B, TXT_DIM), jnp.float32)   # synthetic text features

    feat_dim = C * POOL * POOL
    w_img = 0.02 * jax.random.normal(kwi, (feat_dim, EMB_DIM), jnp.float32)
    w_txt = 0.02 * jax.random.normal(kwt, (TXT_DIM, EMB_DIM), jnp.float32)
    logit_scale = 1.0 / 0.07                                # CLIP logit scale

    # --- host-side float64 construction + full affine folding ----------------
    rh = _bicubic_resize_matrix(H, OUT_HW)                  # (224, H)
    rw = _bicubic_resize_matrix(W, OUT_HW)                  # (224, W)
    pool_m = _avg_pool_matrix(OUT_HW, POOL)                 # (7, 224)
    # Affine folding requires resize/pool rows to sum to exactly 1.
    assert np.allclose(rh.sum(axis=1), 1.0, atol=1e-9)
    assert np.allclose(rw.sum(axis=1), 1.0, atol=1e-9)
    a_np = pool_m @ rh                                      # (7, H)   rows, height
    bw_np = pool_m @ rw                                     # (7, W)   rows, width

    inv_scale = 0.5 / IMAGENET_STD                          # (C,)
    offset = (0.5 - IMAGENET_MEAN) / IMAGENET_STD           # (C,)

    # Fold rescale + resize + Normalize + pool + flatten + w_img into G, bias_g:
    #   ie[b,e] = sum_{c,h,w} x[b,c,h,w] * G[(c,h,w),e] + bias_g[e]
    w_img64 = np.asarray(w_img, dtype=np.float64).reshape(C, POOL, POOL, EMB_DIM)
    g_np = np.einsum("ih,jw,cije->chwe", a_np, bw_np, w_img64, optimize=True)
    g_np = inv_scale[:, None, None, None] * g_np            # (C, H, W, E)
    g_np = g_np.reshape(C * H * W, EMB_DIM)                 # (768, 32)
    bias_np = np.einsum("c,cije->e", offset, w_img64)       # (E,)

    g_mat = jnp.asarray(g_np, dtype=jnp.float32)
    bias_g = jnp.asarray(bias_np.reshape(1, EMB_DIM), dtype=jnp.float32)
    neg_scale = jnp.asarray([-logit_scale], dtype=jnp.float32)

    # Lane-dense flattened image input (768 = 6*128); contiguous reshape is cheap.
    x_flat = x.reshape(B, C * H * W)

    # Hot path (single Pallas call, single grid step): folded image projection,
    # text projection, L2 norms, and -scale * similarity.
    out = clip_forward_neg_logits(x_flat, g_mat, bias_g, y, w_txt, neg_scale)
    out = jax.block_until_ready(out)

    assert out.shape == (B, B) and out.dtype == jnp.float32
    assert bool(jnp.all(jnp.isfinite(out)))

    # --- correctness check vs. an unfused float64 NumPy reference ------------
    x64 = np.asarray(x, dtype=np.float64)
    x01 = (x64 + 1.0) * 0.5
    resized = np.einsum("oh,bchw,pw->bcop", rh, x01, rw, optimize=True)
    xn = (resized - IMAGENET_MEAN.reshape(1, C, 1, 1)) / IMAGENET_STD.reshape(1, C, 1, 1)
    pooled_ref = xn.reshape(B, C, POOL, OUT_HW // POOL, POOL, OUT_HW // POOL).mean(axis=(3, 5))
    feat_ref = pooled_ref.reshape(B, feat_dim)

    ie = feat_ref @ np.asarray(w_img, dtype=np.float64)
    te = np.asarray(y, dtype=np.float64) @ np.asarray(w_txt, dtype=np.float64)
    ie = ie / np.sqrt((ie * ie).sum(-1, keepdims=True) + 1e-12)
    te = te / np.sqrt((te * te).sum(-1, keepdims=True) + 1e-12)
    ref_out = -(logit_scale * (ie @ te.T))
    assert np.allclose(np.asarray(out), ref_out, rtol=1e-3, atol=1e-3)

    print("KERNEL_OK")
</pallas_src>

<mosaic_0001>
module attributes {stable_mosaic.version = 11 : i64} {
  func.func @_clip_fused_kernel(%arg0: memref<2x768xf32, #tpu.memory_space<vmem>>, %arg1: memref<768x32xf32, #tpu.memory_space<vmem>>, %arg2: memref<1x32xf32, #tpu.memory_space<vmem>>, %arg3: memref<2x32xf32, #tpu.memory_space<vmem>>, %arg4: memref<32x32xf32, #tpu.memory_space<vmem>>, %arg5: memref<1xf32, #tpu.memory_space<smem>>, %arg6: memref<2x2xf32, #tpu.memory_space<vmem>>) attributes {dimension_semantics = [], scalar_prefetch = 0 : i64, scratch_operands = 0 : i64, tpu.core_type = #tpu.core_type<tc>} {
    %c0 = arith.constant 0 : index
    %c0_0 = arith.constant 0 : index
    %0 = vector.load %arg0[%c0, %c0_0] : memref<2x768xf32, #tpu.memory_space<vmem>>, vector<2x768xf32>
    %c0_1 = arith.constant 0 : index
    %c0_2 = arith.constant 0 : index
    %1 = vector.load %arg1[%c0_1, %c0_2] : memref<768x32xf32, #tpu.memory_space<vmem>>, vector<768x32xf32>
    %cst = arith.constant dense<0.000000e+00> : vector<2x32xf32>
    %2 = tpu.matmul %0, %1, %cst {dimension_numbers = #tpu.dot_dimension_numbers<[1], [0], [0], [1], [0, 0, 1, 1], [], []>} : vector<2x768xf32>, vector<768x32xf32>, vector<2x32xf32> -> vector<2x32xf32>
    %c0_3 = arith.constant 0 : index
    %c0_4 = arith.constant 0 : index
    %3 = vector.load %arg2[%c0_3, %c0_4] : memref<1x32xf32, #tpu.memory_space<vmem>>, vector<1x32xf32>
    %4 = vector.broadcast %3 : vector<1x32xf32> to vector<2x32xf32>
    %5 = arith.addf %2, %4 : vector<2x32xf32>
    %c0_5 = arith.constant 0 : index
    %c0_6 = arith.constant 0 : index
    %6 = vector.load %arg3[%c0_5, %c0_6] : memref<2x32xf32, #tpu.memory_space<vmem>>, vector<2x32xf32>
    %c0_7 = arith.constant 0 : index
    %c0_8 = arith.constant 0 : index
    %7 = vector.load %arg4[%c0_7, %c0_8] : memref<32x32xf32, #tpu.memory_space<vmem>>, vector<32x32xf32>
    %cst_9 = arith.constant dense<0.000000e+00> : vector<2x32xf32>
    %8 = tpu.matmul %6, %7, %cst_9 {dimension_numbers = #tpu.dot_dimension_numbers<[1], [0], [0], [1], [0, 0, 1, 1], [], []>} : vector<2x32xf32>, vector<32x32xf32>, vector<2x32xf32> -> vector<2x32xf32>
    %9 = arith.mulf %5, %5 : vector<2x32xf32>
    %cst_10 = arith.constant dense<0.000000e+00> : vector<2xf32>
    %10 = vector.multi_reduction <add>, %9, %cst_10 [1] : vector<2x32xf32> to vector<2xf32>
    %11 = vector.shape_cast %10 : vector<2xf32> to vector<2x1xf32>
    %cst_11 = arith.constant 9.99999996E-13 : f32
    %12 = vector.broadcast %cst_11 : f32 to vector<2x1xf32>
    %13 = arith.addf %11, %12 : vector<2x1xf32>
    %14 = math.rsqrt %13 : vector<2x1xf32>
    %15 = vector.broadcast %14 : vector<2x1xf32> to vector<2x32xf32>
    %16 = arith.mulf %5, %15 : vector<2x32xf32>
    %17 = arith.mulf %8, %8 : vector<2x32xf32>
    %cst_12 = arith.constant dense<0.000000e+00> : vector<2xf32>
    %18 = vector.multi_reduction <add>, %17, %cst_12 [1] : vector<2x32xf32> to vector<2xf32>
    %19 = vector.shape_cast %18 : vector<2xf32> to vector<2x1xf32>
    %cst_13 = arith.constant 9.99999996E-13 : f32
    %20 = vector.broadcast %cst_13 : f32 to vector<2x1xf32>
    %21 = arith.addf %19, %20 : vector<2x1xf32>
    %22 = math.rsqrt %21 : vector<2x1xf32>
    %23 = vector.broadcast %22 : vector<2x1xf32> to vector<2x32xf32>
    %24 = arith.mulf %8, %23 : vector<2x32xf32>
    %cst_14 = arith.constant dense<0.000000e+00> : vector<2x2xf32>
    %25 = tpu.matmul %16, %24, %cst_14 {dimension_numbers = #tpu.dot_dimension_numbers<[1], [1], [0], [0], [0, 0, 1, 0], [], []>} : vector<2x32xf32>, vector<2x32xf32>, vector<2x2xf32> -> vector<2x2xf32>
    %c0_15 = arith.constant 0 : index
    %26 = memref.load %arg5[%c0_15] : memref<1xf32, #tpu.memory_space<smem>>
    %27 = vector.broadcast %26 : f32 to vector<2x2xf32>
    %28 = arith.mulf %27, %25 : vector<2x2xf32>
    %c0_16 = arith.constant 0 : index
    %c0_17 = arith.constant 0 : index
    %29 = vector.load %arg6[%c0_16, %c0_17] : memref<2x2xf32, #tpu.memory_space<vmem>>, vector<2x2xf32>
    tpu.vector_store %arg6[%c0_16, %c0_17], %28 {strides = array<i32>} : memref<2x2xf32, #tpu.memory_space<vmem>>, vector<2x2xf32>,
    return
  }
}

</mosaic_0001>

<bundles_post_ra>
// kernel: tpu_custom_call.1
= control target key start
LH: loop header
LB: loop body
LE: loop exit
PB: predicated region body
PF: predicated region fallthrough
CT: control target
= control target key end

     0   :  { %v831_v47 = vmov 1983009808   ;;  %v136_v49 = vlaneseq  ;;  %s1208_s0 = inlined_call_operand.vmem [shape: f32[2,768], index: 0, kind: input, shape index: {}]   ;;  %s1209_s1 = inlined_call_operand.vmem [shape: f32[768,32], index: 1, kind: input, shape index: {}]   ;;  %s1210_s2 = inlined_call_operand.vmem [shape: f32[1,32], index: 2, kind: input, shape index: {}]   ;;  %s1211_s3 = inlined_call_operand.vmem [shape: f32[2,32], index: 3, kind: input, shape index: {}]   ;;  %s1212_s4 = inlined_call_operand.vmem [shape: f32[32,32], index: 4, kind: input, shape index: {}]   ;;  %s1213_s5 = inlined_call_operand.<no memory space> [shape: f32[1], index: 5, kind: input, shape index: {}]   ;;  %s1214_s6 = inlined_call_operand.hbm [shape: f32[2,2], index: 6, kind: output, shape index: {}]  }
   0x1   :  { %v43_v0 = vld [vmem:[%s1209_s1 + $0x80] sm:$0xff]  ;;  %v44_v1 = vld [vmem:[%s1209_s1 + $0x88] sm:$0xff]  ;;  %v45_v11 = vld [vmem:[%s1209_s1 + $0x90] sm:$0xff]  ;;  %v134_v48 = vunpack.c.l.s4 %v831_v47 }
   0x2   :  { %v75_v2 = vld [vmem:[%s1209_s1 + $0x180] sm:$0xff]  ;;  %v695_v3 = vpack.c.bf16 %v44_v1, %v43_v0  ;;  %v76_v4 = vld [vmem:[%s1209_s1 + $0x188] sm:$0xff]  ;;  %v46_v13 = vld [vmem:[%s1209_s1 + $0x98] sm:$0xff]  ;;  %v137_v0 = vshrl.u32 %v136_v49, 7 }
   0x3   :  { %v27_v5 = vld [vmem:[%s1209_s1] sm:$0xff]  ;;  %v28_v6 = vld [vmem:[%s1209_s1 + $0x8] sm:$0xff]  ;;  %v727_v7 = vpack.c.bf16 %v76_v4, %v75_v2  ;;  %v77_v14 = vld [vmem:[%s1209_s1 + $0x190] sm:$0xff]  ;;  %v699_v16 = vpack.c.bf16 %v46_v13, %v45_v11  ;;  %v135_v63 = vunpack.c.0.s8 %v134_v48 }
   0x4   :  { %v697_v8 = vpack.c.bf16 %v28_v6, %v27_v5  ;;  %v59_v9 = vld [vmem:[%s1209_s1 + $0x100] sm:$0xff]  ;;  %v60_v10 = vld [vmem:[%s1209_s1 + $0x108] sm:$0xff]  ;;  %696 = vmatprep.subr.bf16.mxu0 %v695_v3  ;;  %v78_v15 = vld [vmem:[%s1209_s1 + $0x198] sm:$0xff] }
   0x5   :  { %v729_v12 = vpack.c.bf16 %v60_v10, %v59_v9  ;;  %728 = vmatprep.subr.bf16.mxu1 %v727_v7  ;;  %v731_v17 = vpack.c.bf16 %v78_v15, %v77_v14  ;;  %v29_v18 = vld [vmem:[%s1209_s1 + $0x10] sm:$0xff]  ;;  %v30_v19 = vld [vmem:[%s1209_s1 + $0x18] sm:$0xff]  ;;  %v47_v23 = vld [vmem:[%s1209_s1 + $0xa0] sm:$0xff]  ;;  %v138_v13 = vsub.s32 %v135_v63, %v137_v0 }
   0x6   :  { %698 = vmatpush3.bf16.msra.mxu0 %v697_v8  ;;  %v61_v20 = vld [vmem:[%s1209_s1 + $0x110] sm:$0xff]  ;;  %v701_v21 = vpack.c.bf16 %v30_v19, %v29_v18  ;;  %v62_v22 = vld [vmem:[%s1209_s1 + $0x118] sm:$0xff]  ;;  %v48_v24 = vld [vmem:[%s1209_s1 + $0xa8] sm:$0xff] }
   0x7   :  { %730 = vmatpush3.bf16.msra.mxu1 %v729_v12  ;;  %700 = vmatprep.subr.bf16.mxu0 %v699_v16  ;;  %v733_v25 = vpack.c.bf16 %v62_v22, %v61_v20  ;;  %v703_v26 = vpack.c.bf16 %v48_v24, %v47_v23  ;;  %v79_v27 = vld [vmem:[%s1209_s1 + $0x1a0] sm:$0xff]  ;;  %v80_v28 = vld [vmem:[%s1209_s1 + $0x1a8] sm:$0xff]  ;;  %v49_v35 = vld [vmem:[%s1209_s1 + $0xb0] sm:$0xff] }
   0x8   :  { %732 = vmatprep.subr.bf16.mxu1 %v731_v17  ;;  %v31_v29 = vld [vmem:[%s1209_s1 + $0x20] sm:$0xff]  ;;  %v735_v30 = vpack.c.bf16 %v80_v28, %v79_v27  ;;  %v32_v31 = vld [vmem:[%s1209_s1 + $0x28] sm:$0xff]  ;;  %v50_v36 = vld [vmem:[%s1209_s1 + $0xb8] sm:$0xff] }
   0x9   :  { %v63_v32 = vld [vmem:[%s1209_s1 + $0x120] sm:$0xff]  ;;  %v64_v33 = vld [vmem:[%s1209_s1 + $0x128] sm:$0xff]  ;;  %v705_v34 = vpack.c.bf16 %v32_v31, %v31_v29  ;;  %v81_v37 = vld [vmem:[%s1209_s1 + $0x1b0] sm:$0xff]  ;;  %v707_v39 = vpack.c.bf16 %v50_v36, %v49_v35 }
   0xa   :  { %702 = vmatpush3.bf16.msra.mxu0 %v701_v21  ;;  %v737_v38 = vpack.c.bf16 %v64_v33, %v63_v32  ;;  %v82_v40 = vld [vmem:[%s1209_s1 + $0x1b8] sm:$0xff]  ;;  %v33_v41 = vld [vmem:[%s1209_s1 + $0x30] sm:$0xff]  ;;  %v51_v46 = vld [vmem:[%s1209_s1 + $0xc0] sm:$0xff] }
   0xb   :  { %734 = vmatpush3.bf16.msra.mxu1 %v733_v25  ;;  %704 = vmatprep.subr.bf16.mxu0 %v703_v26  ;;  %v34_v42 = vld [vmem:[%s1209_s1 + $0x38] sm:$0xff]  ;;  %v739_v43 = vpack.c.bf16 %v82_v40, %v81_v37  ;;  %v65_v44 = vld [vmem:[%s1209_s1 + $0x130] sm:$0xff]  ;;  %v52_v50 = vld [vmem:[%s1209_s1 + $0xc8] sm:$0xff] }
   0xc   :  { %736 = vmatprep.subr.bf16.mxu1 %v735_v30  ;;  %v66_v45 = vld [vmem:[%s1209_s1 + $0x138] sm:$0xff]  ;;  %v83_v51 = vld [vmem:[%s1209_s1 + $0x1c0] sm:$0xff]  ;;  %v84_v52 = vld [vmem:[%s1209_s1 + $0x1c8] sm:$0xff]  ;;  %v709_v53 = vpack.c.bf16 %v34_v42, %v33_v41  ;;  %v711_v55 = vpack.c.bf16 %v52_v50, %v51_v46 }
   0xd   :  { %v741_v54 = vpack.c.bf16 %v66_v45, %v65_v44  ;;  %v35_v56 = vld [vmem:[%s1209_s1 + $0x40] sm:$0xff]  ;;  %v36_v57 = vld [vmem:[%s1209_s1 + $0x48] sm:$0xff]  ;;  %v743_v59 = vpack.c.bf16 %v84_v52, %v83_v51  ;;  %v53_v61 = vld [vmem:[%s1209_s1 + $0xd0] sm:$0xff] }
   0xe   :  { %706 = vmatpush3.bf16.msra.mxu0 %v705_v34  ;;  %v67_v58 = vld [vmem:[%s1209_s1 + $0x140] sm:$0xff]  ;;  %v68_v60 = vld [vmem:[%s1209_s1 + $0x148] sm:$0xff]  ;;  %v54_v62 = vld [vmem:[%s1209_s1 + $0xd8] sm:$0xff]  ;;  %v713_v3 = vpack.c.bf16 %v36_v57, %v35_v56 }
   0xf   :  { %738 = vmatpush3.bf16.msra.mxu1 %v737_v38  ;;  %708 = vmatprep.subr.bf16.mxu0 %v707_v39  ;;  %v85_v1 = vld [vmem:[%s1209_s1 + $0x1d0] sm:$0xff]  ;;  %v86_v2 = vld [vmem:[%s1209_s1 + $0x1d8] sm:$0xff]  ;;  %v745_v4 = vpack.c.bf16 %v68_v60, %v67_v58  ;;  %v715_v5 = vpack.c.bf16 %v54_v62, %v53_v61  ;;  %v55_v11 = vld [vmem:[%s1209_s1 + $0xe0] sm:$0xff]  ;;  %v832_v62 = vmov 0.0|0.0  }
  0x10   :  { %740 = vmatprep.subr.bf16.mxu1 %v739_v43  ;;  %v37_v6 = vld [vmem:[%s1209_s1 + $0x50] sm:$0xff]  ;;  %v38_v7 = vld [vmem:[%s1209_s1 + $0x58] sm:$0xff]  ;;  %v747_v9 = vpack.c.bf16 %v86_v2, %v85_v1  ;;  %v56_v12 = vld [vmem:[%s1209_s1 + $0xe8] sm:$0xff] }
  0x11   :  { %v69_v8 = vld [vmem:[%s1209_s1 + $0x150] sm:$0xff]  ;;  %v70_v10 = vld [vmem:[%s1209_s1 + $0x158] sm:$0xff]  ;;  %v87_v14 = vld [vmem:[%s1209_s1 + $0x1e0] sm:$0xff]  ;;  %v717_v16 = vpack.c.bf16 %v38_v7, %v37_v6  ;;  %v719_v19 = vpack.c.bf16 %v56_v12, %v55_v11 }
  0x12   :  { %710 = vmatpush3.bf16.msra.mxu0 %v709_v53  ;;  %v88_v15 = vld [vmem:[%s1209_s1 + $0x1e8] sm:$0xff]  ;;  %v39_v17 = vld [vmem:[%s1209_s1 + $0x60] sm:$0xff]  ;;  %v749_v18 = vpack.c.bf16 %v70_v10, %v69_v8  ;;  %v57_v25 = vld [vmem:[%s1209_s1 + $0xf0] sm:$0xff] }
  0x13   :  { %742 = vmatpush3.bf16.msra.mxu1 %v741_v54  ;;  %712 = vmatprep.subr.bf16.mxu0 %v711_v55  ;;  %v40_v20 = vld [vmem:[%s1209_s1 + $0x68] sm:$0xff]  ;;  %v71_v21 = vld [vmem:[%s1209_s1 + $0x160] sm:$0xff]  ;;  %v751_v23 = vpack.c.bf16 %v88_v15, %v87_v14  ;;  %v58_v26 = vld [vmem:[%s1209_s1 + $0xf8] sm:$0xff] }
  0x14   :  { %744 = vmatprep.subr.bf16.mxu1 %v743_v59  ;;  %v25_v22 = vld [vmem:[%s1208_s0] sm:$0xff]  ;;  %v72_v24 = vld [vmem:[%s1209_s1 + $0x168] sm:$0xff]  ;;  %v89_v29 = vld [vmem:[%s1209_s1 + $0x1f0] sm:$0xff]  ;;  %v721_v31 = vpack.c.bf16 %v40_v20, %v39_v17  ;;  %v723_v35 = vpack.c.bf16 %v58_v26, %v57_v25 }
  0x15   :  { %v139_v27 = vrot.slane %v25_v22, %v138_v13  ;;  %v132_v28 = vcombine.high %v25_v22, %v25_v22  ;;  %v90_v30 = vld [vmem:[%s1209_s1 + $0x1f8] sm:$0xff]  ;;  %v753_v34 = vpack.c.bf16 %v72_v24, %v71_v21  ;;  %v41_v36 = vld [vmem:[%s1209_s1 + $0x70] sm:$0xff]  ;;  %v107_v42 = vld [vmem:[%s1209_s1 + $0x280] sm:$0xff] }
  0x16   :  { %714 = vmatpush3.bf16.msra.mxu0 %v713_v3  ;;  %v42_v37 = vld [vmem:[%s1209_s1 + $0x78] sm:$0xff]  ;;  %v73_v38 = vld [vmem:[%s1209_s1 + $0x170] sm:$0xff]  ;;  %v755_v39 = vpack.c.bf16 %v90_v30, %v89_v29  ;;  %v108_v43 = vld [vmem:[%s1209_s1 + $0x288] sm:$0xff] }
  0x17   :  { %746 = vmatpush3.bf16.msra.mxu1 %v745_v4  ;;  %716 = vmatprep.subr.bf16.mxu0 %v715_v5  ;;  %v147_v32 = vcombine.high %v139_v27, %v139_v27  ;;  %v146_v33 = vrot.slane %v132_v28, %v138_v13  ;;  %v74_v40 = vld [vmem:[%s1209_s1 + $0x178] sm:$0xff]  ;;  %v725_v44 = vpack.c.bf16 %v42_v37, %v41_v36  ;;  %v91_v47 = vld [vmem:[%s1209_s1 + $0x200] sm:$0xff]  ;;  %v92_v48 = vld [vmem:[%s1209_s1 + $0x208] sm:$0xff] }
  0x18   :  { %748 = vmatprep.subr.bf16.mxu1 %v747_v9  ;;  %v757_v45 = vpack.c.bf16 %v74_v40, %v73_v38  ;;  %v759_v46 = vpack.c.bf16 %v108_v43, %v107_v42  ;;  %v374_v49 = vld [vmem:[%s1212_s4] sm:$0xff]  ;;  %v375_v50 = vld [vmem:[%s1212_s4 + $0x8] sm:$0xff]  ;;  %v109_v51 = vld [vmem:[%s1209_s1 + $0x290] sm:$0xff]  ;;  %v761_v53 = vpack.c.bf16 %v92_v48, %v91_v47 }
  0x19   :  { %227 = vmatprep.mubr.f32.mxu0 %v147_v32  ;;  %v148_v41 = vcombine.high %v146_v33, %v146_v33  ;;  %v110_v52 = vld [vmem:[%s1209_s1 + $0x298] sm:$0xff]  ;;  %v93_v54 = vld [vmem:[%s1209_s1 + $0x210] sm:$0xff]  ;;  %v792_v57 = vpack.c.bf16 %v375_v50, %v374_v49  ;;  %v111_v60 = vld [vmem:[%s1209_s1 + $0x2a0] sm:$0xff] }
  0x1a   :  { %718 = vmatpush3.bf16.msra.mxu0 %v717_v16  ;;  %v94_v55 = vld [vmem:[%s1209_s1 + $0x218] sm:$0xff]  ;;  %v376_v56 = vld [vmem:[%s1212_s4 + $0x10] sm:$0xff]  ;;  %v763_v58 = vpack.c.bf16 %v110_v52, %v109_v51  ;;  %v112_v61 = vld [vmem:[%s1209_s1 + $0x2a8] sm:$0xff] }
  0x1b   :  { %750 = vmatpush3.bf16.msra.mxu1 %v749_v18  ;;  %720 = vmatprep.subr.bf16.mxu0 %v719_v19  ;;  %v377_v59 = vld [vmem:[%s1212_s4 + $0x18] sm:$0xff]  ;;  %v1111_v63 = vld.sshfl [vmem:[%s1208_s0 + $0x8] sm:$0x33 pattern:$0x76325410] }
  0x1c   :  { %752 = vmatprep.subr.bf16.mxu1 %v751_v23  ;;  %297 = vmatprep.mubr.f32.mxu1 %v148_v41 }
  0x1e   :  { %722 = vmatpush3.bf16.msra.mxu0 %v721_v31 }
  0x1f   :  { %754 = vmatpush3.bf16.msra.mxu1 %v753_v34  ;;  %724 = vmatprep.subr.bf16.mxu0 %v723_v35 }
  0x20   :  { %756 = vmatprep.subr.bf16.mxu1 %v755_v39 }
  0x22   :  { %726 = vmatpush3.bf16.msra.mxu0 %v725_v44 }
  0x23   :  { %758 = vmatpush3.bf16.msra.mxu1 %v757_v45  ;;  %760 = vmatprep.subr.bf16.mxu0 %v759_v46 }
  0x24   :  { %791 = vmatprep.subr.bf16.mxu1 %v832_v62 }
  0x25   :  { %12 = vsyncpa [#allocation4], 0  ;;  %228 = vmatmul.mubr.f32.vlgmr.msra.gmra.mrb[0].mxu0 %v139_v27  ;;  %v156_v0 = vcombine.high %v1111_v63, %v1111_v63  ;;  %v765_v1 = vpack.c.bf16 %v94_v55, %v93_v54  ;;  %v795_v2 = vpack.c.bf16 %v377_v59, %v376_v56  ;;  %v767_v3 = vpack.c.bf16 %v112_v61, %v111_v60  ;;  %v95_v4 = vld [vmem:[%s1209_s1 + $0x220] sm:$0xff]  ;;  %v96_v5 = vld [vmem:[%s1209_s1 + $0x228] sm:$0xff]  ;;  %s835_s7 = smov [#allocation3]  }
  0x26   :  { %298 = vmatmul.mubr.f32.vlgmr.msra.gmra.mrb[0].mxu1 %v146_v33  ;;  %762 = vmatpush3.bf16.msra.mxu0 %v761_v53  ;;  %vm833_vm0 = vmmov 0   ;;  %v834_v6 = vmov 0.0   ;;  %v113_v7 = vld [vmem:[%s1209_s1 + $0x2b0] sm:$0xff]  ;;  %v114_v8 = vld [vmem:[%s1209_s1 + $0x2b8] sm:$0xff]  ;;  %v769_v9 = vpack.c.bf16 %v96_v5, %v95_v4  ;;  %v373_v10 = vld [vmem:[%s1211_s3] sm:$0x3] }
  0x27   :  { %793 = vmatpush3.bf16.msra.mxu1 %v792_v57  ;;  %764 = vmatprep.subr.bf16.mxu0 %v763_v58  ;;  %vm378_vm1 = vcmask 261120   ;;  %v771_v11 = vpack.c.bf16 %v114_v8, %v113_v7  ;;  %v97_v12 = vld [vmem:[%s1209_s1 + $0x230] sm:$0xff]  ;;  %v98_v13 = vld [vmem:[%s1209_s1 + $0x238] sm:$0xff]  ;;  %v115_v14 = vld [vmem:[%s1209_s1 + $0x2c0] sm:$0xff]  ;;  %vm453_vm2 = vcmask 254976   ;;  %s554_s8 = sshll.u32 %s835_s7, 4  ;;  %s555_s8 = int_to_ptr.vmem [resolvable:$true] %s554_s8 }
  0x28   :  { %794 = vmatprep.subr.bf16.mxu1 %v832_v62  ;;  %687 = vmatprep.mubr.msk.f32.mxu1 %vm833_vm0, %v834_v6  ;;  %v116_v15 = vld [vmem:[%s1209_s1 + $0x2c8] sm:$0xff]  ;;  %v773_v16 = vpack.c.bf16 %v98_v13, %v97_v12  ;;  %v99_v18 = vld [vmem:[%s1209_s1 + $0x240] sm:$0xff]  ;;  %v117_v20 = vld [vmem:[%s1209_s1 + $0x2d0] sm:$0xff]  ;;  %vm546_vm3 = vcmask 9216   ;;  %s807_s9 = scalar_lea.vmem %s555_s8, 32  ;;  %p812_p1 = scmp.lt.s32.totalorder %s555_s8, %s555_s8 }
  0x29   :  { %367 = vmatprep.mubr.f32.mxu0 %v156_v0  ;;  %v775_v17 = vpack.c.bf16 %v116_v15, %v115_v14  ;;  %v100_v19 = vld [vmem:[%s1209_s1 + $0x248] sm:$0xff]  ;;  %v118_v21 = vld [vmem:[%s1209_s1 + $0x2d8] sm:$0xff]  ;;  %v101_v24 = vld [vmem:[%s1209_s1 + $0x250] sm:$0xff]  ;;  %p808_p0 = scmp.ne.s32.totalorder %s555_s8, %s807_s9  ;;  %p813_p2 = scmp.lt.s32.totalorder %s807_s9, %s807_s9 }
  0x2a   :  { %766 = vmatpush3.bf16.msra.mxu0 %v765_v1  ;;  %v777_v22 = vpack.c.bf16 %v100_v19, %v99_v18  ;;  %v779_v23 = vpack.c.bf16 %v118_v21, %v117_v20  ;;  %v102_v25 = vld [vmem:[%s1209_s1 + $0x258] sm:$0xff]  ;;  %v119_v26 = vld [vmem:[%s1209_s1 + $0x2e0] sm:$0xff]  ;;  %v120_v27 = vld [vmem:[%s1209_s1 + $0x2e8] sm:$0xff] }
  0x2b   :  { %796 = vmatpush3.bf16.msra.mxu1 %v795_v2  ;;  %768 = vmatprep.subr.bf16.mxu0 %v767_v3  ;;  %v781_v28 = vpack.c.bf16 %v102_v25, %v101_v24  ;;  %v783_v29 = vpack.c.bf16 %v120_v27, %v119_v26  ;;  %v103_v30 = vld [vmem:[%s1209_s1 + $0x260] sm:$0xff]  ;;  %v104_v31 = vld [vmem:[%s1209_s1 + $0x268] sm:$0xff]  ;;  %v121_v32 = vld [vmem:[%s1209_s1 + $0x2f0] sm:$0xff]  ;;  %v544_v2 = vstv %s1213_s5  ;;  %p814_p3 = por %p813_p2, %p812_p1 }
  0x2c   :  { %690 = vmatprep.subr.mxu1 %v834_v6  ;;  %v122_v33 = vld [vmem:[%s1209_s1 + $0x2f8] sm:$0xff]  ;;  %v785_v34 = vpack.c.bf16 %v104_v31, %v103_v30  ;;  %v105_v36 = vld [vmem:[%s1209_s1 + $0x270] sm:$0xff]  ;;  %v562_v40 = vld [vmem:[%s1210_s2] ss:$0 sm:$0xff] }
  0x2d   :  { %v787_v35 = vpack.c.bf16 %v122_v33, %v121_v32  ;;  %v106_v37 = vld [vmem:[%s1209_s1 + $0x278] sm:$0xff]  ;;  %p815_p4 = pnand %p814_p3, %p808_p0 }
  0x2e   :  { %688 = vmatmul.mubr.msk.f32.vlgmr.msra.gmra.mrb[2].mxu1 %vm378_vm1, %v373_v10  ;;  %770 = vmatpush3.bf16.msra.mxu0 %v769_v9  ;;  %v789_v38 = vpack.c.bf16 %v106_v37, %v105_v36 }
  0x2f   :  { %772 = vmatprep.subr.bf16.mxu0 %v771_v11  ;;  %692 = vmatprep.mubr.msk.f32.mxu1 %vm833_vm0, %v834_v6 }
  0x32   :  { %774 = vmatpush3.bf16.msra.mxu0 %v773_v16 }
  0x33   :  { %776 = vmatprep.subr.bf16.mxu0 %v775_v17 }
  0x36   :  { %778 = vmatpush3.bf16.msra.mxu0 %v777_v22 }
  0x37   :  { %780 = vmatprep.subr.bf16.mxu0 %v779_v23 }
  0x3a   :  { %782 = vmatpush3.bf16.msra.mxu0 %v781_v28 }
  0x3b   :  { %784 = vmatprep.subr.bf16.mxu0 %v783_v29 }
  0x3e   :  { %786 = vmatpush3.bf16.msra.mxu0 %v785_v34 }
  0x3f   :  { %788 = vmatprep.subr.bf16.mxu0 %v787_v35 }
  0x42   :  { %790 = vmatpush3.bf16.msra.mxu0 %v789_v38 }
  0x45   :  { %368 = vmatmul.mubr.f32.vlgmr.msra.gmra.mrb[2].mxu0 %v1111_v63 }
  0xf8   :  { %v599_v39 = vpop.f32.mrb[0].mxu0 }
  0xf9   :  { %v600_v41 = vpop.f32.mrb[1].mxu0  ;;  %v634_v42 = vpop.f32.mrb[0].mxu1 }
  0xfa   :  { %v601_v43 = vadd.f32 %v600_v41, %v599_v39  ;;  %v635_v44 = vpop.f32.mrb[1].mxu1 }
  0xfb   :  { %v636_v45 = vadd.f32 %v635_v44, %v634_v42 }
  0xfc   :  { %v230_v46 = vadd.f32 %v601_v43, %v562_v40 }
  0xfe   :  { %v300_v47 = vadd.f32 %v636_v45, %v230_v46 }
 0x101   :  { %v448_v48 = vpop.f32.mrb[2].mxu1 }
 0x102   :  { %v460_v49 = vmul.f32 %v448_v48, %v448_v48  ;;  %v689_v50 = vpop.f32.mrb[3].mxu1 }
 0x104   :  { %v461_v51 = vsel %vm453_vm2, %v460_v49, 0.0 }
 0x105   :  { %462 = vadd.xlane.f32.xlu0 %v461_v51 }
 0x118   :  { %v669_v52 = vpop.f32.mrb[2].mxu0 }
 0x119   :  { %v670_v53 = vpop.f32.mrb[3].mxu0 }
 0x11a   :  { %v671_v54 = vadd.f32 %v670_v53, %v669_v52 }
 0x11c   :  { %v370_v55 = vadd.f32 %v671_v54, %v300_v47 }
 0x11e   :  { %v452_v56 = vmul.f32 %v370_v55, %v370_v55 }
 0x120   :  { %v454_v57 = vsel %vm453_vm2, %v452_v56, 0.0 }
 0x121   :  { %455 = vadd.xlane.f32.xlu0 %v454_v57 }
 0x192   :  { %v463_v58 = vpop.xlane.xlu0 %462 }
 0x193   :  { %v464_v59 = vadd.f32 1e-12, %v463_v58 }
 0x195   :  { %803 = vrsqrt.f32 %v464_v59 }
 0x19f   :  { %v804_v60 = vpop.eup %803 }
 0x1a0   :  { %v466_v61 = vmul.f32 %v804_v60, %v448_v48 }
 0x1a2   :  { %691 = vmatpush3.xpose.msk.msra.mxu1 %vm378_vm1, %v466_v61 }
 0x1ae   :  { %v456_v62 = vpop.xlane.xlu0 %455 }
 0x1af   :  { %v457_v63 = vadd.f32 1e-12, %v456_v62 }
 0x1b1   :  { %805 = vrsqrt.f32 %v457_v63 }
 0x1bb   :  { %v806_v0 = vpop.eup %805 }
 0x1bc   :  { %v459_v1 = vmul.f32 %v806_v0, %v370_v55 }
 0x1be   :  { %693 = vmatmul.mubr.msk.f32.vlgmr.msra.gmra.mrb[4].mxu1 %vm378_vm1, %v459_v1 }
 0x291   :  { %v539_v3 = vpop.f32.mrb[4].mxu1 }
 0x292   :  { %v545_v4 = vmul.f32 %v544_v2, %v539_v3  ;;  %v694_v5 = vpop.f32.mrb[5].mxu1 }
 0x294   :  { %547 = vst.msk [vmem:[#allocation3] sm:$0x3] %vm546_vm3, %v545_v4 }
 0x295   :  { %818 = shalt.err (!%p815_p4)
}
 0x296   :  { %s819_s12 = scalar_lea.hbm %s1214_s6, 32 }
 0x297   :  { %p820_p5 = scmp.ne.s32.totalorder %s1214_s6, %s819_s12  ;;  %p823_p6 = scmp.lt.u32.totalorder %s819_s12, %s1214_s6 }
 0x299   :  { %p825_p7 = pnand %p823_p6, %p820_p5 }
 0x29b   :  { %828 = shalt.err (!%p825_p7)
}
 0x29c   :  { %557 = dma.vmem_to_hbm [thread:$0]  %s555_s8, 32, %s1214_s6, [#allocation4]  }
 0x29d   :  { %829 = dma.done.wait [#allocation4], 32  }
 0x29e   :  { %830 = vsyncadd [#allocation4], 4294967264 }
 0x29f   :  { %561 = vsyncpa [#allocation4], 1 }

</bundles_post_ra>
